<compile_context>
chip_gen: v6e
topology: v6e:2x2x1
jax: 0.10.0
libtpu: 0.0.40
codegen_flags: <defaults>
</compile_context>

<pallas_src>
import jax
import jax.numpy as jnp
from jax.experimental import pallas as pl
from jax.experimental.pallas import tpu as pltpu

_LANE = 128
_SUBLANE = 8
_ONEHOT_MAX_VOCAB = 2048        # MXU one-hot path at/below this vocab size
_WIDE_ROW_BYTES = 2048          # rows at/above this go through the DMA engines
_DMA_RING = 8                   # outstanding per-row DMAs in the HBM gather path
_MAX_TOKENS_PER_CALL = 1 << 16  # bounds scalar-prefetched ids' SMEM footprint


def _round_up(x, m):
    return ((x + m - 1) // m) * m


def _vmem_capacity_bytes():
    try:
        return int(pltpu.get_tpu_info().vmem_capacity_bytes)
    except Exception:
        return 64 << 20  # conservative default (v7x per-TensorCore VMEM)


def _clamp_vmem(need_bytes, cap_bytes):
    lo = 32 << 20
    hi = max(cap_bytes - (8 << 20), lo)
    return int(min(max(need_bytes, lo), hi))


def _choose_token_tile(n_tokens, row_bytes, n_vocab, itemsize, use_onehot):
    # Target >= ~0.5 MiB of output per grid step so per-step overhead is
    # amortized (measured tile-size curve: ~85% of HBM roofline needs >=0.5MiB).
    tt = (512 * 1024) // max(row_bytes, 1)
    if use_onehot:
        # Bound the (tt, n_vocab) one-hot temporary to ~2 MiB of VMEM.
        tt = min(tt, max(256, (2 << 20) // max(n_vocab * itemsize, 1)))
    tt = max(_SUBLANE, min(int(tt), 2048))
    tt -= tt % _SUBLANE
    n8 = _round_up(max(n_tokens, 1), _SUBLANE)
    return min(tt, n8)


# --------------------------------------------------------------------------
# Kernel 1: tiny vocab -> one-hot @ table on the MXU (full-width stores).
# --------------------------------------------------------------------------
def _onehot_kernel(ids_ref, table_ref, out_ref):
    # ids_ref:   (TT, 1)     int32, VMEM
    # table_ref: (V, D_pad)  table dtype, VMEM (constant index_map -> fetched once)
    # out_ref:   (TT, D_pad) table dtype
    tt = out_ref.shape[0]
    nv = table_ref.shape[0]
    iota = jax.lax.broadcasted_iota(jnp.int32, (tt, nv), 1)
    onehot = (ids_ref[...] == iota).astype(table_ref.dtype)
    out_ref[...] = jnp.dot(
        onehot,
        table_ref[...],
        preferred_element_type=jnp.float32,
        precision=jax.lax.Precision.HIGHEST,  # exact row selection for f32 tables
    ).astype(out_ref.dtype)


# --------------------------------------------------------------------------
# Kernel 2: mid-size vocab, VMEM-resident table, per-row copy loop.
# --------------------------------------------------------------------------
def _rowcopy_kernel(ids_ref, table_ref, out_ref):
    # ids_ref:   (N_pad,)    int32, SMEM (scalar prefetch, pre-clipped)
    # table_ref: (V, D_pad)  VMEM resident (constant index_map, single-buffered)
    # out_ref:   (TT, D_pad)
    tt = out_ref.shape[0]
    base = pl.program_id(0) * tt

    def body(t, carry):
        tok = ids_ref[base + t]
        out_ref[pl.ds(t, 1), :] = table_ref[pl.ds(tok, 1), :]
        return carry

    jax.lax.fori_loop(0, tt, body, 0, unroll=8)


# --------------------------------------------------------------------------
# Kernel 3: big tables / wide rows -> HBM table + per-row async DMA gather.
# --------------------------------------------------------------------------
def _dma_gather_kernel(ids_ref, table_hbm, out_ref, sem):
    # ids_ref:   (N_pad,)    int32, SMEM (scalar prefetch, pre-clipped)
    # table_hbm: (V, D_pad)  HBM (memory_space=pl.ANY)
    # out_ref:   (TT, D_pad) VMEM output tile (DMA'd into directly)
    # sem:       DMA semaphores, shape (_DMA_RING,)
    tt = out_ref.shape[0]
    nbuf = sem.shape[0]
    base = pl.program_id(0) * tt

    def start(t):
        tok = ids_ref[base + t]
        pltpu.make_async_copy(
            table_hbm.at[pl.ds(tok, 1), :],
            out_ref.at[pl.ds(t, 1), :],
            sem.at[t % nbuf],
        ).start()

    def wait(t):
        pltpu.make_async_copy(
            table_hbm.at[pl.ds(0, 1), :],
            out_ref.at[pl.ds(t, 1), :],
            sem.at[t % nbuf],
        ).wait()

    @pl.loop(0, min(nbuf, tt))
    def _prime(t):
        start(t)

    @pl.loop(0, tt)
    def _step(t):
        wait(t)

        @pl.when(t + nbuf < tt)
        def _():
            start(t + nbuf)


# --------------------------------------------------------------------------
# Dispatch / wrapper
# --------------------------------------------------------------------------
def _embed_tokens(ids, table, n_vocab, d_pad):
    """ids: int32[N] (pre-clipped); table: [n_vocab, d_pad] -> [N, d_pad]."""
    (n_tok,) = ids.shape
    dtype = table.dtype
    itemsize = jnp.dtype(dtype).itemsize
    row_bytes = d_pad * itemsize
    table_bytes = n_vocab * row_bytes
    cap = _vmem_capacity_bytes()
    slack = 4 << 20

    use_onehot = n_vocab <= _ONEHOT_MAX_VOCAB
    token_tile = _choose_token_tile(n_tok, row_bytes, n_vocab, itemsize, use_onehot)
    n_pad = _round_up(n_tok, token_tile)
    grid = (n_pad // token_tile,)
    out_tile_bytes = token_tile * row_bytes

    if use_onehot:
        onehot_bytes = token_tile * n_vocab * (itemsize + 4)  # one-hot + iota temps
        need_onehot = 2 * table_bytes + 2 * out_tile_bytes + onehot_bytes + slack
        use_onehot = need_onehot <= int(0.6 * cap)

    ids_p = ids if n_pad == n_tok else jnp.pad(ids, (0, n_pad - n_tok))
    sem = ("parallel",)

    if use_onehot:
        cost = pl.CostEstimate(
            flops=2 * n_pad * n_vocab * d_pad,
            transcendentals=0,
            bytes_accessed=table_bytes + n_pad * 4 + n_pad * row_bytes,
        )
        out = pl.pallas_call(
            _onehot_kernel,
            out_shape=jax.ShapeDtypeStruct((n_pad, d_pad), dtype),
            grid=grid,
            in_specs=[
                pl.BlockSpec((token_tile, 1), lambda i: (i, 0)),
                pl.BlockSpec((n_vocab, d_pad), lambda i: (0, 0)),
            ],
            out_specs=pl.BlockSpec((token_tile, d_pad), lambda i: (i, 0)),
            compiler_params=pltpu.CompilerParams(
                dimension_semantics=sem,
                vmem_limit_bytes=_clamp_vmem(need_onehot, cap),
            ),
            cost_estimate=cost,
        )(ids_p[:, None], table)
        return out[:n_tok] if n_pad != n_tok else out

    resident_need = table_bytes + 2 * out_tile_bytes + slack
    table_resident = (row_bytes < _WIDE_ROW_BYTES) and (resident_need <= int(0.6 * cap))

    if table_resident:
        cost = pl.CostEstimate(
            flops=0,
            transcendentals=0,
            bytes_accessed=table_bytes + n_pad * 4 + n_pad * row_bytes,
        )
        out = pl.pallas_call(
            _rowcopy_kernel,
            out_shape=jax.ShapeDtypeStruct((n_pad, d_pad), dtype),
            grid_spec=pltpu.PrefetchScalarGridSpec(
                num_scalar_prefetch=1,
                grid=grid,
                in_specs=[
                    # Resident table: constant block index, single-buffered.
                    pl.BlockSpec((n_vocab, d_pad), lambda i, ids: (0, 0),
                                 pipeline_mode=pl.Buffered(1)),
                ],
                out_specs=pl.BlockSpec((token_tile, d_pad), lambda i, ids: (i, 0)),
            ),
            compiler_params=pltpu.CompilerParams(
                dimension_semantics=sem,
                vmem_limit_bytes=_clamp_vmem(resident_need, cap),
            ),
            cost_estimate=cost,
        )(ids_p, table)
        return out[:n_tok] if n_pad != n_tok else out

    # HBM fallback: table too large for VMEM (e.g. v7x 64 MiB/TC) or wide rows.
    need = 2 * out_tile_bytes + slack
    cost = pl.CostEstimate(
        flops=0,
        transcendentals=0,
        bytes_accessed=2 * n_pad * row_bytes + n_pad * 4,
    )
    out = pl.pallas_call(
        _dma_gather_kernel,
        out_shape=jax.ShapeDtypeStruct((n_pad, d_pad), dtype),
        grid_spec=pltpu.PrefetchScalarGridSpec(
            num_scalar_prefetch=1,
            grid=grid,
            in_specs=[pl.BlockSpec(memory_space=pl.ANY)],
            out_specs=pl.BlockSpec((token_tile, d_pad), lambda i, ids: (i, 0)),
            scratch_shapes=[pltpu.SemaphoreType.DMA((_DMA_RING,))],
        ),
        compiler_params=pltpu.CompilerParams(
            dimension_semantics=sem,
            vmem_limit_bytes=_clamp_vmem(need, cap),
        ),
        cost_estimate=cost,
    )(ids_p, table)
    return out[:n_tok] if n_pad != n_tok else out


def input_embedding(x, table):
    """x: int [B, S]; table: [n_vocab, d_emb] -> [B, S, d_emb] (table dtype)."""
    B, S = x.shape
    n_vocab, d_emb = table.shape
    n_tok = B * S

    # Clamp once in the wrapper (hoisted out of the kernel's per-token chain).
    # TODO(synk): nn.Embedding raises on out-of-range ids; we clamp instead.
    ids = jnp.clip(x.reshape(n_tok).astype(jnp.int32), 0, n_vocab - 1)

    # Lane padding of d_emb only when needed; d_emb % 128 == 0 (the common
    # case) keeps the epilogue slice a no-op.
    d_pad = _round_up(d_emb, _LANE)
    table_p = table if d_pad == d_emb else jnp.pad(table, ((0, 0), (0, d_pad - d_emb)))

    if n_tok > _MAX_TOKENS_PER_CALL:
        # Chunk so the scalar-prefetched ids never blow up SMEM.
        parts = [
            _embed_tokens(ids[i:i + _MAX_TOKENS_PER_CALL], table_p, n_vocab, d_pad)
            for i in range(0, n_tok, _MAX_TOKENS_PER_CALL)
        ]
        out = jnp.concatenate(parts, axis=0)
    else:
        out = _embed_tokens(ids, table_p, n_vocab, d_pad)

    if d_pad != d_emb:
        out = out[:, :d_emb]
    return out.reshape(B, S, d_emb)


if __name__ == "__main__":
    key = jax.random.PRNGKey(0)
    k1, k2, k3, k4, k5, k6, k7, k8 = jax.random.split(key, 8)
    B, S = 2, 8

    # 1) Spec-sized demo: tiny vocab -> MXU one-hot path.
    n_vocab, d_emb = 64, 128
    table = jax.random.normal(k1, (n_vocab, d_emb), dtype=jnp.float32)
    x = jax.random.randint(k2, (B, S), 0, n_vocab, dtype=jnp.int32)
    out = jax.block_until_ready(input_embedding(x, table))
    ref = jnp.take(table, x, axis=0)
    assert out.shape == (B, S, d_emb)
    assert jnp.allclose(out, ref, atol=1e-5, rtol=1e-5), "one-hot MXU path mismatch"

    # 2) Mid-size vocab -> VMEM-resident row-gather path (pure copy, bit exact).
    nv2, de2 = 4096, 256
    table2 = jax.random.normal(k3, (nv2, de2), dtype=jnp.float32)
    x2 = jax.random.randint(k4, (B, S), 0, nv2, dtype=jnp.int32)
    out2 = jax.block_until_ready(input_embedding(x2, table2))
    assert jnp.array_equal(out2, jnp.take(table2, x2, axis=0)), "VMEM gather mismatch"

    # 3) Wide rows -> HBM table + per-row DMA gather path (bit exact).
    nv3, de3 = 4096, 512
    table3 = jax.random.normal(k5, (nv3, de3), dtype=jnp.float32)
    x3 = jax.random.randint(k6, (B, S), 0, nv3, dtype=jnp.int32)
    out3 = jax.block_until_ready(input_embedding(x3, table3))
    assert jnp.array_equal(out3, jnp.take(table3, x3, axis=0)), "HBM DMA path mismatch"

    # 4) bf16 table (halves table VMEM + output HBM bytes; gather is bit exact).
    table4 = jax.random.normal(k7, (n_vocab, d_emb), dtype=jnp.float32).astype(jnp.bfloat16)
    x4 = jax.random.randint(k8, (B, S), 0, n_vocab, dtype=jnp.int32)
    out4 = jax.block_until_ready(input_embedding(x4, table4))
    assert out4.dtype == jnp.bfloat16
    assert jnp.array_equal(out4, jnp.take(table4, x4, axis=0)), "bf16 path mismatch"

    print("KERNEL_OK")
</pallas_src>

<mosaic_0001>
module attributes {stable_mosaic.version = 11 : i64} {
  func.func @_onehot_kernel(%arg0: i32, %arg1: memref<16x1xi32, #tpu.memory_space<vmem>>, %arg2: memref<64x128xf32, #tpu.memory_space<vmem>>, %arg3: memref<16x128xf32, #tpu.memory_space<vmem>>) attributes {dimension_semantics = [#tpu.dimension_semantics<parallel>], iteration_bounds = array<i64: 1>, scalar_prefetch = 0 : i64, scratch_operands = 0 : i64, tpu.core_type = #tpu.core_type<tc>, window_params = [{transform_indices = @transform_0, window_bounds = array<i64: 16, 1>}, {pipeline_mode = #tpu.pipeline_mode<synchronous>, transform_indices = @transform_1, window_bounds = array<i64: 64, 128>}, {transform_indices = @transform_2, window_bounds = array<i64: 16, 128>}]} {
    %0 = tpu.iota {dimensions = array<i32: 1>} : vector<16x64xi32>
    %c0 = arith.constant 0 : index
    %c0_0 = arith.constant 0 : index
    %1 = vector.load %arg1[%c0, %c0_0] : memref<16x1xi32, #tpu.memory_space<vmem>>, vector<16x1xi32>
    %2 = vector.broadcast %1 : vector<16x1xi32> to vector<16x64xi32>
    %3 = arith.cmpi eq, %2, %0 : vector<16x64xi32>
    %4 = arith.extui %3 : vector<16x64xi1> to vector<16x64xi32>
    %5 = arith.sitofp %4 : vector<16x64xi32> to vector<16x64xf32>
    %c0_1 = arith.constant 0 : index
    %c0_2 = arith.constant 0 : index
    %6 = vector.load %arg2[%c0_1, %c0_2] : memref<64x128xf32, #tpu.memory_space<vmem>>, vector<64x128xf32>
    %cst = arith.constant dense<0.000000e+00> : vector<16x128xf32>
    %7 = tpu.matmul %5, %6, %cst {dimension_numbers = #tpu.dot_dimension_numbers<[1], [0], [0], [1], [0, 0, 1, 1], [], []>, precision = #tpu.contract_precision<fp32>} : vector<16x64xf32>, vector<64x128xf32>, vector<16x128xf32> -> vector<16x128xf32>
    %c0_3 = arith.constant 0 : index
    %c0_4 = arith.constant 0 : index
    %8 = vector.load %arg3[%c0_3, %c0_4] : memref<16x128xf32, #tpu.memory_space<vmem>>, vector<16x128xf32>
    tpu.vector_store %arg3[%c0_3, %c0_4], %7 {strides = array<i32>} : memref<16x128xf32, #tpu.memory_space<vmem>>, vector<16x128xf32>,
    return
  }
  func.func @transform_0(%arg0: i32) -> (i32, i32) {
    %c0_i32 = arith.constant 0 : i32
    %c0_i32_0 = arith.constant 0 : i32
    return %arg0, %c0_i32 : i32, i32
  }
  func.func @transform_1(%arg0: i32) -> (i32, i32) {
    %c0_i32 = arith.constant 0 : i32
    %c0_i32_0 = arith.constant 0 : i32
    %c0_i32_1 = arith.constant 0 : i32
    return %c0_i32, %c0_i32_0 : i32, i32
  }
  func.func @transform_2(%arg0: i32) -> (i32, i32) {
    %c0_i32 = arith.constant 0 : i32
    %c0_i32_0 = arith.constant 0 : i32
    return %arg0, %c0_i32 : i32, i32
  }
}

</mosaic_0001>

<bundles_post_ra>
// kernel: tpu_custom_call.1
= control target key start
LH: loop header
LB: loop body
LE: loop exit
PB: predicated region body
PF: predicated region fallthrough
CT: control target
= control target key end

     0   :  { %7 = vsyncpa [#allocation3], 0  ;;  %s1108_s0 = inlined_call_operand.vmem [shape: s32[16,1], index: 0, kind: input, shape index: {}]   ;;  %s1109_s1 = inlined_call_operand.hbm [shape: f32[64,128], index: 1, kind: input, shape index: {}]   ;;  %s1110_s2 = inlined_call_operand.hbm [shape: f32[16,128], index: 2, kind: output, shape index: {}]  }
   0x1   :  { %8 = vsyncpa [#allocation4], 0  ;;  %s889_s9 = smov [#allocation2]  }
   0x2   :  { %s16_s10 = sshll.u32 %s889_s9, 4  ;;  %s17_s10 = int_to_ptr.vmem [resolvable:$true] %s16_s10 }
   0x3   :  { %s853_s11 = scalar_lea.vmem %s17_s10, 1024  ;;  %p858_p1 = scmp.lt.s32.totalorder %s17_s10, %s17_s10 }
   0x4   :  { %p854_p0 = scmp.ne.s32.totalorder %s17_s10, %s853_s11  ;;  %p859_p2 = scmp.lt.s32.totalorder %s853_s11, %s853_s11 }
   0x6   :  { %p860_p3 = por %p859_p2, %p858_p1 }
   0x8   :  { %p861_p4 = pnand %p860_p3, %p854_p0 }
   0xa   :  { %864 = shalt.err (!%p861_p4)
}
   0xb   :  { %s890_s12 = smov 128   ;;  %s891_s13 = smov 8  }
   0xc   :  { %22 = dma.hbm_to_vmem [thread:$0]  %s1109_s1, 1024, %s17_s10, [#allocation3], %s890_s12, %s890_s12, %s891_s13  }
   0xd   :  { %885 = dma.done.wait [#allocation3], 1024  }
   0xe   :  { %886 = vsyncadd [#allocation3], 4294966272  ;;  %v892_v0 = vmov 0   ;;  %v28_v1 = vld [vmem:[%s1108_s0] sm:$0xff]  ;;  %v29_v2 = vld [vmem:[%s1108_s0 + $0x8] sm:$0xff]  ;;  %v26_v51 = vlaneseq  ;;  %vm50_vm0 = vcmask 523264  }
   0xf   :  { %844 = vset.pattern.permute.xlu0 %v892_v0  ;;  %v49_v3 = vld [vmem:[#allocation2 + $0x38] sm:$0xff]  ;;  %v48_v5 = vld [vmem:[#allocation2 + $0x30] sm:$0xff]  ;;  %v47_v6 = vld [vmem:[#allocation2 + $0x28] sm:$0xff]  ;;  %v893_v54 = vmov 0.0   ;;  %s894_s0 = smov [#allocation5]  }
  0x10   :  { %31 = vperm.xlu0 %844, %v28_v1   ;;  %v922_v4 = vand.u32 4294901760, %v49_v3  ;;  %v46_v7 = vld [vmem:[#allocation2 + $0x20] sm:$0xff]  ;;  %v924_v8 = vand.u32 4294901760, %v48_v5  ;;  %v926_v9 = vand.u32 4294901760, %v47_v6  ;;  %v45_v11 = vld [vmem:[#allocation2 + $0x18] sm:$0xff]  ;;  %v44_v12 = vld [vmem:[#allocation2 + $0x10] sm:$0xff] }
  0x11   :  { %v928_v10 = vand.u32 4294901760, %v46_v7  ;;  %v43_v13 = vld [vmem:[#allocation2 + $0x8] sm:$0xff]  ;;  %v933_v15 = vand.u32 4294901760, %v45_v11  ;;  %v936_v16 = vand.u32 4294901760, %v44_v12  ;;  %v42_v18 = vld [vmem:[#allocation2] sm:$0xff]  ;;  %v27_v52 = vand.u32 127, %v26_v51 }
  0x12   :  { %v931_v14 = vsub.f32 %v49_v3, %v922_v4  ;;  %724 = vmatprep.subr.mxu0 %v922_v4  ;;  %v938_v17 = vand.u32 4294901760, %v43_v13  ;;  %v941_v19 = vsub.f32 %v48_v5, %v924_v8  ;;  %v944_v20 = vsub.f32 %v47_v6, %v926_v9  ;;  %s644_s1 = sshll.u32 %s894_s0, 4  ;;  %s645_s1 = int_to_ptr.vmem [resolvable:$true] %s644_s1 }
  0x13   :  { %v947_v21 = vsub.f32 %v46_v7, %v928_v10  ;;  %725 = vmatpush3.msra.mxu0 %v922_v4  ;;  %v954_v23 = vsub.f32 %v45_v11, %v933_v15  ;;  %v957_v24 = vsub.f32 %v44_v12, %v936_v16  ;;  %v960_v25 = vand.u32 4294901760, %v42_v18  ;;  %s865_s20 = scalar_lea.vmem %s645_s1, 256  ;;  %p870_p6 = scmp.lt.s32.totalorder %s645_s1, %s645_s1 }
  0x14   :  { %34 = vperm.xlu0 %844, %v29_v2   ;;  %v951_v22 = vand.u32 4294901760, %v931_v14  ;;  %726 = vmatprep.subr.mxu0 %v924_v8  ;;  %v963_v26 = vand.u32 4294901760, %v941_v19  ;;  %v966_v27 = vand.u32 4294901760, %v944_v20  ;;  %v978_v31 = vsub.f32 %v43_v13, %v938_v17  ;;  %p866_p5 = scmp.ne.s32.totalorder %s645_s1, %s865_s20  ;;  %p871_p7 = scmp.lt.s32.totalorder %s865_s20, %s865_s20 }
  0x15   :  { %v969_v28 = vand.u32 4294901760, %v947_v21  ;;  %727 = vmatpush3.msra.mxu0 %v924_v8  ;;  %v975_v30 = vand.u32 4294901760, %v954_v23  ;;  %v989_v36 = vand.u32 4294901760, %v957_v24  ;;  %v992_v37 = vsub.f32 %v42_v18, %v960_v25 }
  0x16   :  { %v170_v29 = vsub.f32 %v931_v14, %v951_v22  ;;  %728 = vmatprep.subr.mxu0 %v926_v9  ;;  %v177_v32 = vsub.f32 %v941_v19, %v963_v26  ;;  %v184_v33 = vsub.f32 %v944_v20, %v966_v27  ;;  %v999_v41 = vand.u32 4294901760, %v978_v31  ;;  %p872_p8 = por %p871_p7, %p870_p6 }
  0x17   :  { %729 = vmatpush3.msra.mxu0 %v926_v9  ;;  %v191_v35 = vsub.f32 %v947_v21, %v969_v28  ;;  %v198_v40 = vsub.f32 %v954_v23, %v975_v30  ;;  %v205_v43 = vsub.f32 %v957_v24, %v989_v36  ;;  %v1006_v44 = vand.u32 4294901760, %v992_v37 }
  0x18   :  { %v171_v34 = vand.u32 4294901760, %v170_v29  ;;  %730 = vmatprep.subr.mxu0 %v928_v10  ;;  %v178_v38 = vand.u32 4294901760, %v177_v32  ;;  %v185_v39 = vand.u32 4294901760, %v184_v33  ;;  %v212_v46 = vsub.f32 %v978_v31, %v999_v41  ;;  %p873_p9 = pnand %p872_p8, %p866_p5 }
  0x19   :  { %731 = vmatpush3.msra.mxu0 %v928_v10  ;;  %v192_v42 = vand.u32 4294901760, %v191_v35  ;;  %v199_v45 = vand.u32 4294901760, %v198_v40  ;;  %v206_v47 = vand.u32 4294901760, %v205_v43  ;;  %v219_v48 = vsub.f32 %v992_v37, %v1006_v44 }
  0x1a   :  { %743 = vmatprep.subr.mxu1 %v171_v34  ;;  %732 = vmatprep.subr.mxu0 %v933_v15  ;;  %v213_v49 = vand.u32 4294901760, %v212_v46 }
  0x1b   :  { %744 = vmatpush3.msra.mxu1 %v171_v34  ;;  %733 = vmatpush3.msra.mxu0 %v933_v15  ;;  %v220_v50 = vand.u32 4294901760, %v219_v48 }
  0x1c   :  { %745 = vmatprep.subr.mxu1 %v178_v38  ;;  %734 = vmatprep.subr.mxu0 %v936_v16 }
  0x1d   :  { %746 = vmatpush3.msra.mxu1 %v178_v38  ;;  %735 = vmatpush3.msra.mxu0 %v936_v16 }
  0x1e   :  { %747 = vmatprep.subr.mxu1 %v185_v39  ;;  %736 = vmatprep.subr.mxu0 %v938_v17 }
  0x1f   :  { %748 = vmatpush3.msra.mxu1 %v185_v39  ;;  %737 = vmatpush3.msra.mxu0 %v938_v17 }
  0x20   :  { %749 = vmatprep.subr.mxu1 %v192_v42  ;;  %738 = vmatprep.subr.mxu0 %v960_v25 }
  0x21   :  { %750 = vmatpush3.msra.mxu1 %v192_v42  ;;  %739 = vmatpush3.msra.mxu0 %v960_v25 }
  0x22   :  { %751 = vmatprep.subr.mxu1 %v199_v45  ;;  %762 = vmatprep.subr.mxu0 %v931_v14 }
  0x23   :  { %752 = vmatpush3.msra.mxu1 %v199_v45 }
  0x24   :  { %753 = vmatprep.subr.mxu1 %v206_v47 }
  0x25   :  { %754 = vmatpush3.msra.mxu1 %v206_v47 }
  0x26   :  { %755 = vmatprep.subr.mxu1 %v213_v49 }
  0x27   :  { %756 = vmatpush3.msra.mxu1 %v213_v49 }
  0x28   :  { %757 = vmatprep.subr.mxu1 %v220_v50 }
  0x29   :  { %758 = vmatpush3.msra.mxu1 %v220_v50 }
  0x2a   :  { %781 = vmatprep.subr.mxu1 %v922_v4 }
  0x8b   :  { %v32_v53 = vpop.permute.xlu0 %31 }
  0x8c   :  { %vm36_vm1 = vcmp.eq.s32.totalorder %v32_v53, %v27_v52 }
  0x8d   :  { %v1020_v55 = vsel %vm36_vm1, 1.0, %v893_v54 }
  0x8e   :  { %v52_v56 = vsel %vm50_vm0, %v1020_v55, 0  ;;  %759 = vmatprep.mubr.msk.f32.mxu1 %vm50_vm0, %v1020_v55 }
  0x8f   :  { %v131_v57 = vsub.f32 %v52_v56, %v52_v56  ;;  %v35_v58 = vpop.permute.xlu0 %34 }
  0x90   :  { %vm37_vm2 = vcmp.eq.s32.totalorder %v35_v58, %v27_v52 }
  0x91   :  { %v1026_v59 = vsel %vm37_vm2, 1.0, %v893_v54  ;;  %v132_v60 = vand.u32 4294901760, %v131_v57 }
  0x92   :  { %v55_v61 = vsel %vm50_vm0, %v1026_v59, 0  ;;  %760 = vmatmul.mubr.msk.f32.vlgmr.msra.gmra.mxu1 %vm50_vm0, %v1026_v59 }
  0x93   :  { %v141_v62 = vsub.f32 %v55_v61, %v55_v61  ;;  %782 = vmatpush3.msra.mxu1 %v922_v4  ;;  %797 = vmatprep.mubr.f32.mxu1 %v132_v60  ;;  %v133_v63 = vsub.f32 %v131_v57, %v132_v60 }
  0x94   :  { %783 = vmatprep.subr.mxu1 %v924_v8 }
  0x95   :  { %784 = vmatpush3.msra.mxu1 %v924_v8  ;;  %v134_v0 = vand.u32 4294901760, %v133_v63  ;;  %v142_v1 = vand.u32 4294901760, %v141_v62 }
  0x96   :  { %785 = vmatprep.subr.mxu1 %v926_v9 }
  0x97   :  { %786 = vmatpush3.msra.mxu1 %v926_v9  ;;  %740 = vmatprep.mubr.f32.mxu0 %v134_v0  ;;  %v143_v2 = vsub.f32 %v141_v62, %v142_v1 }
  0x98   :  { %787 = vmatprep.subr.mxu1 %v928_v10 }
  0x99   :  { %788 = vmatpush3.msra.mxu1 %v928_v10  ;;  %v144_v3 = vand.u32 4294901760, %v143_v2 }
  0x9a   :  { %789 = vmatprep.subr.mxu1 %v933_v15 }
  0x9b   :  { %790 = vmatpush3.msra.mxu1 %v933_v15  ;;  %741 = vmatmul.mubr.f32.vlgmr.msra.gmra.mxu0 %v144_v3 }
  0x9c   :  { %763 = vmatpush3.msra.mxu0 %v931_v14  ;;  %791 = vmatprep.subr.mxu1 %v936_v16 }
  0x9d   :  { %764 = vmatprep.subr.mxu0 %v941_v19  ;;  %778 = vmatprep.mubr.f32.mxu0 %v131_v57 }
  0x9e   :  { %792 = vmatpush3.msra.mxu1 %v936_v16  ;;  %765 = vmatpush3.msra.mxu0 %v941_v19 }
  0x9f   :  { %793 = vmatprep.subr.mxu1 %v938_v17  ;;  %766 = vmatprep.subr.mxu0 %v944_v20 }
  0xa0   :  { %794 = vmatpush3.msra.mxu1 %v938_v17  ;;  %767 = vmatpush3.msra.mxu0 %v944_v20 }
  0xa1   :  { %795 = vmatprep.subr.mxu1 %v960_v25  ;;  %768 = vmatprep.subr.mxu0 %v947_v21 }
  0xa2   :  { %796 = vmatpush3.msra.mxu1 %v960_v25  ;;  %769 = vmatpush3.msra.mxu0 %v947_v21 }
  0xa3   :  { %798 = vmatmul.mubr.f32.vlgmr.msra.gmra.mxu1 %v142_v1  ;;  %819 = vmatprep.subr.mxu1 %v922_v4 }
  0xa4   :  { %770 = vmatprep.subr.mxu0 %v954_v23  ;;  %820 = vmatpush3.msra.mxu1 %v922_v4 }
  0xa5   :  { %835 = vmatprep.mubr.msk.f32.mxu1 %vm50_vm0, %v1020_v55  ;;  %771 = vmatpush3.msra.mxu0 %v954_v23 }
  0xa6   :  { %821 = vmatprep.subr.mxu1 %v924_v8  ;;  %772 = vmatprep.subr.mxu0 %v957_v24 }
  0xa7   :  { %822 = vmatpush3.msra.mxu1 %v924_v8  ;;  %773 = vmatpush3.msra.mxu0 %v957_v24 }
  0xa8   :  { %823 = vmatprep.subr.mxu1 %v926_v9  ;;  %774 = vmatprep.subr.mxu0 %v978_v31 }
  0xa9   :  { %824 = vmatpush3.msra.mxu1 %v926_v9  ;;  %775 = vmatpush3.msra.mxu0 %v978_v31 }
  0xaa   :  { %825 = vmatprep.subr.mxu1 %v928_v10  ;;  %776 = vmatprep.subr.mxu0 %v992_v37 }
  0xab   :  { %826 = vmatpush3.msra.mxu1 %v928_v10  ;;  %777 = vmatpush3.msra.mxu0 %v992_v37 }
  0xac   :  { %827 = vmatprep.subr.mxu1 %v933_v15  ;;  %779 = vmatmul.mubr.f32.vlgmr.msra.gmra.mxu0 %v141_v62 }
  0xad   :  { %800 = vmatprep.subr.mxu0 %v951_v22  ;;  %828 = vmatpush3.msra.mxu1 %v933_v15 }
  0xae   :  { %801 = vmatpush3.msra.mxu0 %v951_v22  ;;  %816 = vmatprep.mubr.msk.f32.mxu0 %vm50_vm0, %v1020_v55 }
  0xaf   :  { %829 = vmatprep.subr.mxu1 %v936_v16  ;;  %802 = vmatprep.subr.mxu0 %v963_v26 }
  0xb0   :  { %830 = vmatpush3.msra.mxu1 %v936_v16  ;;  %803 = vmatpush3.msra.mxu0 %v963_v26 }
  0xb1   :  { %831 = vmatprep.subr.mxu1 %v938_v17  ;;  %804 = vmatprep.subr.mxu0 %v966_v27 }
  0xb2   :  { %832 = vmatpush3.msra.mxu1 %v938_v17  ;;  %805 = vmatpush3.msra.mxu0 %v966_v27 }
  0xb3   :  { %833 = vmatprep.subr.mxu1 %v960_v25  ;;  %806 = vmatprep.subr.mxu0 %v969_v28 }
  0xb4   :  { %834 = vmatpush3.msra.mxu1 %v960_v25  ;;  %807 = vmatpush3.msra.mxu0 %v969_v28 }
  0xb5   :  { %836 = vmatmul.mubr.msk.f32.vlgmr.msra.gmra.mxu1 %vm50_vm0, %v1026_v59  ;;  %808 = vmatprep.subr.mxu0 %v975_v30 }
  0xb6   :  { %809 = vmatpush3.msra.mxu0 %v975_v30 }
  0xb7   :  { %810 = vmatprep.subr.mxu0 %v989_v36 }
  0xb8   :  { %811 = vmatpush3.msra.mxu0 %v989_v36 }
  0xb9   :  { %812 = vmatprep.subr.mxu0 %v999_v41 }
  0xba   :  { %813 = vmatpush3.msra.mxu0 %v999_v41 }
  0xbb   :  { %814 = vmatprep.subr.mxu0 %v1006_v44 }
  0xbc   :  { %815 = vmatpush3.msra.mxu0 %v1006_v44 }
  0xbd   :  { %817 = vmatmul.mubr.msk.f32.vlgmr.msra.gmra.mxu0 %vm50_vm0, %v1026_v59 }
 0x152   :  { %v761_v5 = vpop.f32.mrf.mxu1 }
 0x154   :  { %v257_v8 = vpop.f32.mrf.mxu1 }
 0x15b   :  { %v742_v4 = vpop.f32.mrf.mxu0 }
 0x15c   :  { %v264_v9 = vadd.f32 %v761_v5, %v742_v4 }
 0x15d   :  { %v136_v6 = vpop.f32.mrf.mxu0 }
 0x15e   :  { %v258_v12 = vadd.f32 %v257_v8, %v136_v6 }
 0x163   :  { %v799_v10 = vpop.f32.mrf.mxu1 }
 0x165   :  { %v439_v15 = vpop.f32.mrf.mxu1 }
 0x16c   :  { %v780_v7 = vpop.f32.mrf.mxu0 }
 0x16d   :  { %v359_v13 = vadd.f32 %v780_v7, %v264_v9 }
 0x16e   :  { %v351_v11 = vpop.f32.mrf.mxu0 }
 0x16f   :  { %v352_v14 = vadd.f32 %v351_v11, %v258_v12  ;;  %v448_v16 = vadd.f32 %v799_v10, %v359_v13 }
 0x171   :  { %v440_v20 = vadd.f32 %v439_v15, %v352_v14 }
 0x175   :  { %v837_v17 = vpop.f32.mrf.mxu1 }
 0x177   :  { %v627_v24 = vpop.f32.mrf.mxu1 }
 0x17d   :  { %v818_v18 = vpop.f32.mrf.mxu0 }
 0x17e   :  { %v549_v19 = vadd.f32 %v818_v18, %v448_v16 }
 0x17f   :  { %v542_v21 = vpop.f32.mrf.mxu0 }
 0x180   :  { %v634_v22 = vadd.f32 %v837_v17, %v549_v19  ;;  %v543_v23 = vadd.f32 %v542_v21, %v440_v20 }
 0x182   :  { %638 = vst [vmem:[#allocation5 + $0x8] sm:$0xff] %v634_v22  ;;  %v628_v25 = vadd.f32 %v627_v24, %v543_v23 }
 0x184   :  { %637 = vst [vmem:[#allocation5] sm:$0xff] %v628_v25 }
 0x185   :  { %876 = shalt.err (!%p873_p9)
}
 0x186   :  { %650 = dma.vmem_to_hbm [thread:$0]  %s645_s1, 256, %s1110_s2, [#allocation4], %s890_s12, %s890_s12, %s891_s13  }
 0x187   :  { %887 = dma.done.wait [#allocation4], 256  }
 0x188   :  { %888 = vsyncadd [#allocation4], 4294967040 }
 0x189   :  { %654 = vsyncpa [#allocation3], 1 }
 0x18a   :  { %655 = vsyncpa [#allocation4], 1 }

</bundles_post_ra>
